<compile_context>
chip_gen: v7x
topology: tpu7x:2x2x1
jax: 0.10.0
libtpu: 0.0.40
codegen_flags: <defaults>
</compile_context>

<pallas_src>
import functools

import jax
import jax.numpy as jnp
from jax import lax
from jax.experimental import pallas as pl
from jax.experimental.pallas import tpu as pltpu


def _round_up(n, m):
    return ((n + m - 1) // m) * m


def _round_down(n, m):
    return (n // m) * m


def _vmem_capacity_bytes():
    """Physical per-core VMEM; conservative fallback if the query fails."""
    try:
        cap = int(getattr(pltpu.get_tpu_info(), "vmem_capacity_bytes", 0))
        if cap > 0:
            return cap
    except Exception:
        pass
    return 64 * 1024 * 1024  # v7x per-TensorCore VMEM (smallest of v5e/v6e/v7x)


# --------------------------------------------------------------------------
# Kernels
# --------------------------------------------------------------------------
def _softmax_row_kernel(x_ref, o_ref, *, inv_temp):
    """Fast path: one block holds full rows; softmax over the lane axis."""
    x = x_ref[...].astype(jnp.float32) * inv_temp
    m = jnp.max(x, axis=-1, keepdims=True)
    e = jnp.exp(x - m)
    s = jnp.sum(e, axis=-1, keepdims=True)
    inv = pl.reciprocal(s, approx=True)   # EUP slot
    inv = inv * (2.0 - s * inv)           # one Newton step -> full f32 accuracy
    o_ref[...] = (e * inv).astype(o_ref.dtype)


def _softmax_stats_kernel(x_ref, m_ref, l_ref, *, inv_temp, hw, hw_tile, need_mask):
    """Large-HW pass 1: online running max / scaled sum over HW chunks."""
    j = pl.program_id(1)

    @pl.when(j == 0)
    def _():
        m_ref[...] = jnp.full_like(m_ref, -jnp.inf)
        l_ref[...] = jnp.zeros_like(l_ref)

    x = x_ref[...].astype(jnp.float32) * inv_temp
    if need_mask:
        col = j * hw_tile + lax.broadcasted_iota(jnp.int32, x.shape, 1)
        x = jnp.where(col < hw, x, -jnp.inf)

    m_prev = m_ref[...]
    m_new = jnp.maximum(m_prev, jnp.max(x, axis=-1, keepdims=True))
    alpha = jnp.exp(m_prev - m_new)
    p = jnp.exp(x - m_new)
    l_ref[...] = alpha * l_ref[...] + jnp.sum(p, axis=-1, keepdims=True)
    m_ref[...] = m_new


def _softmax_normalize_kernel(x_ref, m_ref, l_ref, o_ref, *, inv_temp):
    """Large-HW pass 2: exp(x - m) / l per chunk."""
    x = x_ref[...].astype(jnp.float32) * inv_temp
    s = l_ref[...]
    inv = pl.reciprocal(s, approx=True)
    inv = inv * (2.0 - s * inv)
    o_ref[...] = (jnp.exp(x - m_ref[...]) * inv).astype(o_ref.dtype)


# --------------------------------------------------------------------------
# Wrapper
# --------------------------------------------------------------------------
def spatial_softmax(x, temperature=0.1, *, vmem_block_budget=None,
                    force_two_pass=False, hw_tile_hint=None):
    """x: [B, C, H, W] -> softmax over (H*W) per (b, c); same shape and dtype."""
    if temperature <= 0:
        raise ValueError("temperature must be > 0 for SpatialSoftmax")

    B, C, H, W = x.shape
    BC, HW = B * C, H * W
    itemsize = jnp.dtype(x.dtype).itemsize
    sub = {4: 8, 2: 16, 1: 32}.get(itemsize, 8)   # sublane pack for this dtype
    inv_temp = 1.0 / float(temperature)

    x2d = x.reshape(BC, HW)                        # no padding, no extra HBM pass

    # ---- generation-aware VMEM budget ------------------------------------
    phys = _vmem_capacity_bytes()
    cap = max(16 * 1024 * 1024, min(phys - 8 * 1024 * 1024, (phys * 3) // 4))
    budget = int(0.6 * cap)                        # block-sizing budget (headroom)
    if vmem_block_budget is not None:
        budget = min(int(vmem_block_budget), budget)

    HW_ceil = _round_up(HW, 128)                   # lane footprint of one row in VMEM
    # 2x input + 2x output (double buffered) + ~3 f32 tile-sized temporaries.
    bytes_per_row = HW_ceil * (4 * itemsize + 3 * 4)

    fits_full_rows = (min(sub, BC) * bytes_per_row) <= budget

    if fits_full_rows and not force_two_pass:
        # ---- fast path: one block per row-tile holds the full spatial axis ----
        if BC <= sub:
            tile = BC                              # block dim == array dim: legal
        else:
            tile_rows_cap = _round_down(BC, sub)   # never exceed the array
            tile_vmem = max(sub, _round_down(budget // bytes_per_row, sub))
            tile_perf = max(sub, _round_down((4 * 1024 * 1024) // (HW_ceil * itemsize), sub))
            tile = min(tile_vmem, tile_perf, tile_rows_cap)
            if BC >= 8 * sub:                      # >= ~8 grid steps: pipeline steady state
                tile = min(tile, max(sub, _round_down(BC // 8, sub)))
            grid0 = pl.cdiv(BC, tile)
            if grid0 > 1 and grid0 % 2 == 1 and tile > sub:
                alt = tile - sub                   # best-effort even split over 2 TCs (v7x)
                if pl.cdiv(BC, alt) % 2 == 0:
                    tile = alt
        grid = pl.cdiv(BC, tile)

        footprint = tile * HW_ceil * (4 * itemsize + 3 * 4) + 4 * 1024 * 1024
        vmem_limit = int(min(cap, max(footprint, 16 * 1024 * 1024)))

        kernel = functools.partial(_softmax_row_kernel, inv_temp=inv_temp)
        out2d = pl.pallas_call(
            kernel,
            out_shape=jax.ShapeDtypeStruct((BC, HW), x.dtype),
            grid_spec=pltpu.PrefetchScalarGridSpec(
                num_scalar_prefetch=0,
                grid=(grid,),
                in_specs=[pl.BlockSpec((tile, HW), lambda i: (i, 0))],
                out_specs=pl.BlockSpec((tile, HW), lambda i: (i, 0)),
            ),
            compiler_params=pltpu.CompilerParams(
                dimension_semantics=("parallel",),
                vmem_limit_bytes=vmem_limit,
            ),
            cost_estimate=pl.CostEstimate(
                flops=5 * BC * HW,
                transcendentals=BC * HW,
                bytes_accessed=2 * BC * HW * itemsize,
            ),
        )(x2d)
        return out2d.reshape(B, C, H, W)

    # ---- fallback: two-pass lane-tiled online softmax for very large H*W ----
    row_tile = BC if BC < sub else sub
    if hw_tile_hint is not None:
        hw_tile = max(128, _round_down(int(hw_tile_hint), 128))
    else:
        hw_tile = 64 * 1024                        # multiple of 128, ~2 MiB f32 blocks
    hw_tile = min(hw_tile, HW_ceil)
    n_rows = pl.cdiv(BC, row_tile)
    n_hw = pl.cdiv(HW, hw_tile)
    need_mask = (HW % hw_tile) != 0

    footprint_fb = row_tile * hw_tile * (4 * itemsize + 3 * 4) + 4 * 1024 * 1024
    vmem_limit_fb = int(min(cap, max(footprint_fb, 16 * 1024 * 1024)))

    stats = functools.partial(_softmax_stats_kernel, inv_temp=inv_temp,
                              hw=HW, hw_tile=hw_tile, need_mask=need_mask)
    m_arr, l_arr = pl.pallas_call(
        stats,
        out_shape=(jax.ShapeDtypeStruct((BC, 1), jnp.float32),
                   jax.ShapeDtypeStruct((BC, 1), jnp.float32)),
        grid_spec=pltpu.PrefetchScalarGridSpec(
            num_scalar_prefetch=0,
            grid=(n_rows, n_hw),
            in_specs=[pl.BlockSpec((row_tile, hw_tile), lambda i, j: (i, j))],
            out_specs=(pl.BlockSpec((row_tile, 1), lambda i, j: (i, 0)),
                       pl.BlockSpec((row_tile, 1), lambda i, j: (i, 0))),
        ),
        compiler_params=pltpu.CompilerParams(
            dimension_semantics=("parallel", "arbitrary"),
            vmem_limit_bytes=vmem_limit_fb,
        ),
        cost_estimate=pl.CostEstimate(
            flops=5 * BC * HW,
            transcendentals=2 * BC * HW,
            bytes_accessed=BC * HW * itemsize,
        ),
    )(x2d)

    norm = functools.partial(_softmax_normalize_kernel, inv_temp=inv_temp)
    out2d = pl.pallas_call(
        norm,
        out_shape=jax.ShapeDtypeStruct((BC, HW), x.dtype),
        grid_spec=pltpu.PrefetchScalarGridSpec(
            num_scalar_prefetch=0,
            grid=(n_rows, n_hw),
            in_specs=[pl.BlockSpec((row_tile, hw_tile), lambda i, j: (i, j)),
                      pl.BlockSpec((row_tile, 1), lambda i, j: (i, 0)),
                      pl.BlockSpec((row_tile, 1), lambda i, j: (i, 0))],
            out_specs=pl.BlockSpec((row_tile, hw_tile), lambda i, j: (i, j)),
        ),
        compiler_params=pltpu.CompilerParams(
            dimension_semantics=("parallel", "parallel"),
            vmem_limit_bytes=vmem_limit_fb,
        ),
        cost_estimate=pl.CostEstimate(
            flops=4 * BC * HW,
            transcendentals=BC * HW,
            bytes_accessed=2 * BC * HW * itemsize,
        ),
    )(x2d, m_arr, l_arr)
    return out2d.reshape(B, C, H, W)


def spatial_softmax_ref(x, temperature=0.1):
    B, C, H, W = x.shape
    x2 = x.reshape(B, C, -1) / temperature
    return jax.nn.softmax(x2, axis=-1).reshape(B, C, H, W)


if __name__ == "__main__":
    key = jax.random.PRNGKey(0)

    # Main path: B=2, C=4, H=W=16.
    B, C, H, W = 2, 4, 16, 16
    x = jax.random.normal(key, (B, C, H, W), dtype=jnp.float32)
    out = jax.block_until_ready(spatial_softmax(x, temperature=0.1))
    ref = spatial_softmax_ref(x, temperature=0.1)
    assert out.shape == (B, C, H, W)
    assert out.dtype == x.dtype
    assert jnp.allclose(out, ref, atol=1e-5, rtol=1e-5)
    assert jnp.allclose(out.reshape(B, C, -1).sum(-1), 1.0, atol=1e-5)

    # Non-multiple-of-128 spatial size: full-HW block, masked tail store, no pads.
    x_odd = jax.random.normal(jax.random.PRNGKey(1), (2, 3, 7, 9), dtype=jnp.float32)
    out_odd = jax.block_until_ready(spatial_softmax(x_odd, temperature=0.1))
    assert jnp.allclose(out_odd, spatial_softmax_ref(x_odd, 0.1), atol=1e-5, rtol=1e-5)

    # Exercise the large-H*W two-pass online-softmax fallback at a small shape.
    out_fb = jax.block_until_ready(
        spatial_softmax(x, temperature=0.1, force_two_pass=True, hw_tile_hint=128))
    assert jnp.allclose(out_fb, ref, atol=1e-5, rtol=1e-5)

    print("KERNEL_OK")
</pallas_src>

<mosaic_0001>
module attributes {stable_mosaic.version = 11 : i64} {
  func.func @_softmax_row_kernel(%arg0: i32, %arg1: memref<8x256xf32, #tpu.memory_space<vmem>>, %arg2: memref<8x256xf32, #tpu.memory_space<vmem>>) attributes {dimension_semantics = [#tpu.dimension_semantics<parallel>], iteration_bounds = array<i64: 1>, scalar_prefetch = 0 : i64, scratch_operands = 0 : i64, tpu.core_type = #tpu.core_type<tc>, window_params = [{transform_indices = @transform_0, window_bounds = array<i64: 8, 256>}, {transform_indices = @transform_1, window_bounds = array<i64: 8, 256>}]} {
    %c0 = arith.constant 0 : index
    %c0_0 = arith.constant 0 : index
    %0 = vector.load %arg1[%c0, %c0_0] : memref<8x256xf32, #tpu.memory_space<vmem>>, vector<8x256xf32>
    %cst = arith.constant 1.000000e+01 : f32
    %1 = vector.broadcast %cst : f32 to vector<8x256xf32>
    %2 = arith.mulf %0, %1 : vector<8x256xf32>
    %cst_1 = arith.constant dense<0xFF800000> : vector<8xf32>
    %3 = vector.multi_reduction <maximumf>, %2, %cst_1 [1] : vector<8x256xf32> to vector<8xf32>
    %4 = vector.shape_cast %3 : vector<8xf32> to vector<8x1xf32>
    %5 = vector.broadcast %4 : vector<8x1xf32> to vector<8x256xf32>
    %6 = arith.subf %2, %5 : vector<8x256xf32>
    %7 = math.exp %6 : vector<8x256xf32>
    %cst_2 = arith.constant dense<0.000000e+00> : vector<8xf32>
    %8 = vector.multi_reduction <add>, %7, %cst_2 [1] : vector<8x256xf32> to vector<8xf32>
    %9 = vector.shape_cast %8 : vector<8xf32> to vector<8x1xf32>
    %10 = tpu.reciprocal %9 {approx = true} : vector<8x1xf32> -> vector<8x1xf32>
    %11 = arith.mulf %9, %10 : vector<8x1xf32>
    %cst_3 = arith.constant 2.000000e+00 : f32
    %12 = vector.broadcast %cst_3 : f32 to vector<8x1xf32>
    %13 = arith.subf %12, %11 : vector<8x1xf32>
    %14 = arith.mulf %10, %13 : vector<8x1xf32>
    %15 = vector.broadcast %14 : vector<8x1xf32> to vector<8x256xf32>
    %16 = arith.mulf %7, %15 : vector<8x256xf32>
    %c0_4 = arith.constant 0 : index
    %c0_5 = arith.constant 0 : index
    %17 = vector.load %arg2[%c0_4, %c0_5] : memref<8x256xf32, #tpu.memory_space<vmem>>, vector<8x256xf32>
    tpu.vector_store %arg2[%c0_4, %c0_5], %16 {strides = array<i32>} : memref<8x256xf32, #tpu.memory_space<vmem>>, vector<8x256xf32>,
    return
  }
  func.func @transform_0(%arg0: i32) -> (i32, i32) {
    %c0_i32 = arith.constant 0 : i32
    %c0_i32_0 = arith.constant 0 : i32
    return %arg0, %c0_i32 : i32, i32
  }
  func.func @transform_1(%arg0: i32) -> (i32, i32) {
    %c0_i32 = arith.constant 0 : i32
    %c0_i32_0 = arith.constant 0 : i32
    return %arg0, %c0_i32 : i32, i32
  }
}

</mosaic_0001>

<bundles_post_ra>
// kernel: tpu_custom_call.1
= control target key start
LH: loop header
LB: loop body
LE: loop exit
PB: predicated region body
PF: predicated region fallthrough
CT: control target
= control target key end

     0   :  { %6 = vsyncpa [#allocation3], 0  ;;  %s152_s0 = inlined_call_operand.hbm [shape: f32[8,256], index: 0, kind: input, shape index: {}]   ;;  %s153_s1 = inlined_call_operand.hbm [shape: f32[8,256], index: 1, kind: output, shape index: {}]  }
   0x1   :  { %7 = vsyncpa [#allocation4], 0  ;;  %s116_s6 = smov [#allocation2]   ;;  %s68_s10 = scalar_lea.hbm %s152_s0, 256 }
   0x2   :  { %s14_s7 = sshll.u32 %s116_s6, 4  ;;  %p69_p0 = scmp.ne.s32.totalorder %s152_s0, %s68_s10  ;;  %s15_s7 = int_to_ptr.vmem [resolvable:$true] %s14_s7 }
   0x3   :  { %p72_p1 = scmp.lt.u32.totalorder %s68_s10, %s152_s0 }
   0x5   :  { %p74_p2 = pnand %p72_p1, %p69_p0 }
   0x7   :  { %77 = shalt.err (!%p74_p2)
}
   0x8   :  { %s78_s15 = scalar_lea.vmem %s15_s7, 256  ;;  %p83_p4 = scmp.lt.s32.totalorder %s15_s7, %s15_s7 }
   0x9   :  { %p79_p3 = scmp.ne.s32.totalorder %s15_s7, %s78_s15  ;;  %p84_p5 = scmp.lt.s32.totalorder %s78_s15, %s78_s15 }
   0xb   :  { %p85_p6 = por %p84_p5, %p83_p4 }
   0xd   :  { %p86_p7 = pnand %p85_p6, %p79_p3 }
   0xf   :  { %89 = shalt.err (!%p86_p7)
}
  0x10   :  { %17 = dma.hbm_to_vmem [thread:$0]  %s152_s0, 256, %s15_s7, [#allocation3]  }
  0x11   :  { %112 = dma.done.wait [#allocation3], 256  }
  0x12   :  { %113 = vsyncadd [#allocation3], 4294967040  ;;  %v21_v0 = vld [vmem:[#allocation2] sm:$0xff]  ;;  %v22_v1 = vld [vmem:[#allocation2 + $0x8] sm:$0xff]  ;;  %s117_s0 = smov [#allocation5]  }
  0x13   :  { %v23_v2 = vmul.f32 10.0, %v21_v0  ;;  %v24_v3 = vmul.f32 10.0, %v22_v1  ;;  %s51_s18 = sshll.u32 %s117_s0, 4  ;;  %s52_s18 = int_to_ptr.vmem [resolvable:$true] %s51_s18 }
  0x14   :  { %s90_s19 = scalar_lea.vmem %s52_s18, 256  ;;  %p95_p9 = scmp.lt.s32.totalorder %s52_s18, %s52_s18 }
  0x15   :  { %v25_v4 = vmax.f32 %v23_v2, %v24_v3  ;;  %p91_p8 = scmp.ne.s32.totalorder %s52_s18, %s90_s19  ;;  %p96_p10 = scmp.lt.s32.totalorder %s90_s19, %s90_s19 }
  0x17   :  { %26 = vmax.xlane.f32.xlu0 %v25_v4  ;;  %p97_p11 = por %p96_p10, %p95_p9 }
  0x19   :  { %p98_p12 = pnand %p97_p11, %p91_p8 }
  0xa4   :  { %v27_v5 = vpop.xlane.xlu0 %26 }
  0xa5   :  { %v28_v6 = vsub.f32 %v23_v2, %v27_v5  ;;  %v29_v7 = vsub.f32 %v24_v3, %v27_v5 }
  0xa7   :  { %v30_v8 = vmul.f32 1.442695, %v28_v6  ;;  %v32_v9 = vmul.f32 1.442695, %v29_v7 }
  0xa9   :  { %62 = vpow2.f32 %v30_v8 }
  0xaa   :  { %64 = vpow2.f32 %v32_v9 }
  0xb3   :  { %v63_v10 = vpop.eup %62 }
  0xb4   :  { %v65_v11 = vpop.eup %64 }
  0xb5   :  { %v34_v12 = vadd.f32 %v65_v11, %v63_v10 }
  0xb7   :  { %35 = vadd.xlane.f32.xlu0 %v34_v12 }
 0x144   :  { %v36_v13 = vpop.xlane.xlu0 %35 }
 0x145   :  { %66 = vrcp.f32 %v36_v13 }
 0x14f   :  { %v67_v14 = vpop.eup %66 }
 0x150   :  { %v38_v15 = vmul.f32 %v67_v14, %v36_v13 }
 0x152   :  { %v39_v16 = vsub.f32 2.0, %v38_v15 }
 0x154   :  { %v40_v17 = vmul.f32 %v67_v14, %v39_v16 }
 0x156   :  { %v41_v18 = vmul.f32 %v63_v10, %v40_v17  ;;  %v42_v19 = vmul.f32 %v65_v11, %v40_v17 }
 0x158   :  { %43 = vst [vmem:[#allocation5] sm:$0xff] %v41_v18  ;;  %44 = vst [vmem:[#allocation5 + $0x8] sm:$0xff] %v42_v19 }
 0x159   :  { %101 = shalt.err (!%p98_p12)
}
 0x15a   :  { %s102_s22 = scalar_lea.hbm %s153_s1, 256 }
 0x15b   :  { %p103_p13 = scmp.ne.s32.totalorder %s153_s1, %s102_s22  ;;  %p106_p0 = scmp.lt.u32.totalorder %s102_s22, %s153_s1 }
 0x15d   :  { %p108_p1 = pnand %p106_p0, %p103_p13 }
 0x15f   :  { %111 = shalt.err (!%p108_p1)
}
 0x160   :  { %54 = dma.vmem_to_hbm [thread:$0]  %s52_s18, 256, %s153_s1, [#allocation4]  }
 0x161   :  { %114 = dma.done.wait [#allocation4], 256  }
 0x162   :  { %115 = vsyncadd [#allocation4], 4294967040 }
 0x163   :  { %58 = vsyncpa [#allocation3], 1 }
 0x164   :  { %59 = vsyncpa [#allocation4], 1 }

</bundles_post_ra>
